<compile_context>
chip_gen: v6e
topology: v6e:2x2x1
jax: 0.10.0
libtpu: 0.0.40
codegen_flags: <defaults>
</compile_context>

<pallas_src>
import jax
import jax.numpy as jnp
from jax.experimental import pallas as pl
from jax.experimental.pallas import tpu as pltpu


# ----------------------------- VMEM / tiling ---------------------------------
def _tpu_vmem_capacity_bytes():
    try:
        return int(pltpu.get_tpu_info().vmem_capacity_bytes)
    except Exception:
        return 64 * 1024 * 1024          # conservative (v7x-sized) fallback


def _padded_tile_bytes(rows, cols, itemsize=4):
    # f32 VMEM tiles are padded to (8, 128)
    return (-(-rows // 8) * 8) * (-(-cols // 128) * 128) * itemsize


def _block_footprint_bytes(tb, C, H, W, h, w):
    img = tb * C * _padded_tile_bytes(H, W)          # image block   (TB, C, H, W)
    out = img                                        # output block  (1, TB, C, H, W)
    sx = tb * _padded_tile_bytes(w, W)               # Sx block      (1, TB, w, W)
    yt = tb * _padded_tile_bytes(H, h)               # Yt block      (1, TB, H, h)
    sig = _padded_tile_bytes((C + 1) * h, w)         # resident sigmoid operand
    return 2 * (img + out + sx + yt + sig)           # Pallas double-buffers everything


def _pick_batch_tile(N, n, C, H, W, h, w, vmem_capacity):
    budget = vmem_capacity // 4                      # generous headroom for scratch
    tb = N
    while tb > 1 and (N % tb != 0 or _block_footprint_bytes(tb, C, H, W, h, w) > budget):
        tb -= 1
    # keep >= 2 grid steps so dual-TensorCore chips (v7x) are fully used
    if n * (N // tb) < 2 and N >= 2:
        tb = N // 2
        while tb > 1 and N % tb != 0:
            tb -= 1
    return max(tb, 1)


# ----------------------------- Pallas kernel ----------------------------------
def blend_pallas(sig_cm, Sx, Yt, I, *, batch_tile=None):
    """sig_cm: ((C+1)*h, w) f32 — trigger channels first, mask as the LAST row block
       Sx:     (n, N, w, W) f32 — per-(rep, sample) x-axis bilinear operator
       Yt:     (n, N, H, h) f32 — per-(rep, sample) y-axis operator (pre-transposed)
       I:      (N, C, H, W) f32
       returns (n, N, C, H, W) f32
    """
    n, N, w, W = Sx.shape
    H, h = Yt.shape[2], Yt.shape[3]
    C = I.shape[1]
    assert I.shape == (N, C, H, W)
    assert sig_cm.shape == ((C + 1) * h, w)
    assert Yt.shape == (n, N, H, h)

    vmem_cap = _tpu_vmem_capacity_bytes()
    TB = batch_tile or _pick_batch_tile(N, n, C, H, W, h, w, vmem_cap)
    grid = (N // TB, n)   # rep axis innermost -> image block reused across reps

    def kernel(sig_ref, x_ref, y_ref, i_ref, o_ref):
        sig = sig_ref[...]                                        # ((C+1)*h, w) resident
        for s in range(TB):                                       # static unroll (small TB)
            Xs = x_ref[0, s]                                      # (w, W)
            Ys = y_ref[0, s]                                      # (H, h)
            # separable bilinear resample of [trigger; mask] on the MXU
            B = jnp.dot(sig, Xs, preferred_element_type=jnp.float32)        # ((C+1)*h, W)
            m = jnp.dot(Ys, B[C * h:(C + 1) * h],
                        preferred_element_type=jnp.float32)                 # (H, W) mask
            for c in range(C):                                    # sublane-aligned slices
                trig = jnp.dot(Ys, B[c * h:(c + 1) * h],
                               preferred_element_type=jnp.float32)          # (H, W)
                x = i_ref[s, c]                                             # (H, W)
                o_ref[0, s, c] = (x + m * (trig - x)).astype(o_ref.dtype)   # FMA-form blend

    return pl.pallas_call(
        kernel,
        out_shape=jax.ShapeDtypeStruct((n, N, C, H, W), I.dtype),
        grid=grid,
        in_specs=[
            pl.BlockSpec(((C + 1) * h, w), lambda b, r: (0, 0)),      # resident sigmoids
            pl.BlockSpec((1, TB, w, W), lambda b, r: (r, b, 0, 0)),   # contiguous Sx block
            pl.BlockSpec((1, TB, H, h), lambda b, r: (r, b, 0, 0)),   # contiguous Yt block
            pl.BlockSpec((TB, C, H, W), lambda b, r: (b, 0, 0, 0)),   # image: rep-invariant
        ],
        out_specs=pl.BlockSpec((1, TB, C, H, W), lambda b, r: (r, b, 0, 0, 0)),
        compiler_params=pltpu.CompilerParams(
            dimension_semantics=("parallel", "parallel"),
            vmem_limit_bytes=vmem_cap // 2),
    )(sig_cm, Sx, Yt, I)


# ------------------------------ JAX glue --------------------------------------
def _axis_sampling_matrix(g, in_size):
    """1-D bilinear grid_sample weights (align_corners=False, zeros padding).
    g: (..., out_size) normalized coords.  Returns (..., in_size, out_size)."""
    ip = ((g + 1.0) * in_size - 1.0) * 0.5            # unnormalize
    i0 = jnp.floor(ip)
    w1 = ip - i0
    idx = jnp.arange(in_size, dtype=jnp.float32)

    def tap(i, wt):
        hit = (idx[:, None] == i[..., None, :]).astype(jnp.float32)  # zero when OOB
        return hit * wt[..., None, :]

    return tap(i0, 1.0 - w1) + tap(i0 + 1.0, w1)


def _build_sampling_operands(params, img_shape, key, n, aug):
    N, C, H, W = img_shape
    _, _, h, w = params["mask"].shape

    # sigmoid hoisted out of the kernel; trigger channels first, mask LAST
    sig = jax.nn.sigmoid(jnp.concatenate(
        [params["trigger"].reshape(C, h, w),
         params["mask"].reshape(1, h, w)], axis=0).astype(jnp.float32))      # (C+1, h, w)
    sig_cm = sig.reshape((C + 1) * h, w)

    if aug:
        ksz, koff = jax.random.split(key)
        scale = max(h, w) / min(W, H)
        # torch: exp(U(0,1).clamp(min=0)) / scale   (the clamp is a no-op on U[0,1))
        sz = jnp.exp(jnp.clip(jax.random.uniform(ksz, (n, N), jnp.float32), 0.0)) / scale
        off = (jax.random.uniform(koff, (n, N, 2), jnp.float32, -0.8, 0.8)
               + params["offset"][None, None, :]) * sz[..., None]            # (n, N, 2)
        # rotation is exactly 0 (torch uses 0 * theta), so affine_grid + grid_sample
        # factorize into independent x / y bilinear operators.
        xs = (2.0 * jnp.arange(W, dtype=jnp.float32) + 1.0) / W - 1.0        # (W,)
        ys = (2.0 * jnp.arange(H, dtype=jnp.float32) + 1.0) / H - 1.0        # (H,)
        gx = sz[..., None] * xs + off[..., 0:1]                              # (n, N, W)
        gy = sz[..., None] * ys + off[..., 1:2]                              # (n, N, H)
        Sx = _axis_sampling_matrix(gx, w)                                    # (n, N, w, W)
        Yt = jnp.swapaxes(_axis_sampling_matrix(gy, h), -1, -2)              # (n, N, H, h)
    else:
        # TODO(synk): aug=False assumes (h, w) == (H, W) (identity sampling), as in torch.
        Sx = jnp.broadcast_to(jnp.eye(w, W, dtype=jnp.float32), (n, N, w, W))
        Yt = jnp.broadcast_to(jnp.eye(H, h, dtype=jnp.float32), (n, N, H, h))
    return sig_cm, Sx, Yt


def init_params(key, c, h, w, alpha_bias=-0.1):
    k_mask, k_trig, k_off = jax.random.split(key, 3)
    return {
        "mask": jax.random.uniform(k_mask, (1, 1, h, w), jnp.float32, -0.1, 0.1) + alpha_bias,
        "trigger": jax.random.uniform(k_trig, (1, c, h, w), jnp.float32, -0.1, 0.1),
        "theta": jnp.zeros((1,), jnp.float32),
        "offset": jax.random.uniform(k_off, (2,), jnp.float32, -0.1, 0.1),
    }


def forward(params, I, key, n=1, aug=True):
    N, C, H, W = I.shape
    sig_cm, Sx, Yt = _build_sampling_operands(params, I.shape, key, n, aug)
    out = blend_pallas(sig_cm, Sx, Yt, I.astype(jnp.float32))     # (n, N, C, H, W)
    return out.reshape(n * N, C, H, W)                            # rep-major, like torch.cat


def _reference_forward(params, I, key, n=1, aug=True):
    """Pure-JAX reference (dense contraction) for correctness checking."""
    N, C, H, W = I.shape
    h = params["mask"].shape[2]
    sig_cm, Sx, Yt = _build_sampling_operands(params, I.shape, key, n, aug)
    sig = sig_cm.reshape(C + 1, h, -1)                            # (C+1, h, w)
    samp = jnp.einsum('rbHh,chw,rbwW->rbcHW', Yt, sig, Sx,
                      precision=jax.lax.Precision.HIGHEST)        # (n, N, C+1, H, W)
    trig, m = samp[:, :, :C], samp[:, :, C:]
    out = I[None].astype(jnp.float32) * (1.0 - m) + trig * m
    return out.reshape(n * N, C, H, W)


# -------------------------------- main -----------------------------------------
if __name__ == "__main__":
    key = jax.random.PRNGKey(0)
    k_param, k_input, k_fwd = jax.random.split(key, 3)

    c, h, w = 4, 16, 16
    N = 2
    params = init_params(k_param, c, h, w, alpha_bias=-0.1)
    I = jax.random.normal(k_input, (N, c, h, w), jnp.float32)

    out = forward(params, I, k_fwd, n=2, aug=True)
    out = jax.block_until_ready(out)

    assert out.shape == (2 * N, c, h, w), out.shape
    assert bool(jnp.all(jnp.isfinite(out)))

    ref = _reference_forward(params, I, k_fwd, n=2, aug=True)
    err = float(jnp.max(jnp.abs(out - ref)))
    assert bool(jnp.allclose(out, ref, rtol=3e-2, atol=3e-2)), err

    print("KERNEL_OK")
</pallas_src>

<mosaic_0001>
module attributes {stable_mosaic.version = 11 : i64} {
  func.func @kernel(%arg0: i32, %arg1: i32, %arg2: memref<80x16xf32, #tpu.memory_space<vmem>>, %arg3: memref<1x2x16x16xf32, #tpu.memory_space<vmem>>, %arg4: memref<1x2x16x16xf32, #tpu.memory_space<vmem>>, %arg5: memref<2x4x16x16xf32, #tpu.memory_space<vmem>>, %arg6: memref<1x2x4x16x16xf32, #tpu.memory_space<vmem>>) attributes {dimension_semantics = [#tpu.dimension_semantics<parallel>, #tpu.dimension_semantics<parallel>], iteration_bounds = array<i64: 1, 2>, scalar_prefetch = 0 : i64, scratch_operands = 0 : i64, tpu.core_type = #tpu.core_type<tc>, window_params = [{pipeline_mode = #tpu.pipeline_mode<synchronous>, transform_indices = @transform_0, window_bounds = array<i64: 80, 16>}, {transform_indices = @transform_1, window_bounds = array<i64: 1, 2, 16, 16>}, {transform_indices = @transform_2, window_bounds = array<i64: 1, 2, 16, 16>}, {transform_indices = @transform_3, window_bounds = array<i64: 2, 4, 16, 16>}, {transform_indices = @transform_4, window_bounds = array<i64: 1, 2, 4, 16, 16>}]} {
    %c0 = arith.constant 0 : index
    %c0_0 = arith.constant 0 : index
    %0 = vector.load %arg2[%c0, %c0_0] : memref<80x16xf32, #tpu.memory_space<vmem>>, vector<80x16xf32>
    %c0_1 = arith.constant 0 : index
    %c0_2 = arith.constant 0 : index
    %c0_3 = arith.constant 0 : index
    %c0_4 = arith.constant 0 : index
    %1 = vector.load %arg3[%c0_1, %c0_2, %c0_3, %c0_4] : memref<1x2x16x16xf32, #tpu.memory_space<vmem>>, vector<1x1x16x16xf32>
    %2 = vector.shape_cast %1 : vector<1x1x16x16xf32> to vector<16x16xf32>
    %c0_5 = arith.constant 0 : index
    %c0_6 = arith.constant 0 : index
    %c0_7 = arith.constant 0 : index
    %c0_8 = arith.constant 0 : index
    %3 = vector.load %arg4[%c0_5, %c0_6, %c0_7, %c0_8] : memref<1x2x16x16xf32, #tpu.memory_space<vmem>>, vector<1x1x16x16xf32>
    %4 = vector.shape_cast %3 : vector<1x1x16x16xf32> to vector<16x16xf32>
    %cst = arith.constant dense<0.000000e+00> : vector<80x16xf32>
    %5 = tpu.matmul %0, %2, %cst {dimension_numbers = #tpu.dot_dimension_numbers<[1], [0], [0], [1], [0, 0, 1, 1], [], []>} : vector<80x16xf32>, vector<16x16xf32>, vector<80x16xf32> -> vector<80x16xf32>
    %6 = vector.extract_strided_slice %5 {offsets = [64, 0], sizes = [16, 16], strides = [1, 1]} : vector<80x16xf32> to vector<16x16xf32>
    %cst_9 = arith.constant dense<0.000000e+00> : vector<16x16xf32>
    %7 = tpu.matmul %4, %6, %cst_9 {dimension_numbers = #tpu.dot_dimension_numbers<[1], [0], [0], [1], [0, 0, 1, 1], [], []>} : vector<16x16xf32>, vector<16x16xf32>, vector<16x16xf32> -> vector<16x16xf32>
    %8 = vector.extract_strided_slice %5 {offsets = [0, 0], sizes = [16, 16], strides = [1, 1]} : vector<80x16xf32> to vector<16x16xf32>
    %cst_10 = arith.constant dense<0.000000e+00> : vector<16x16xf32>
    %9 = tpu.matmul %4, %8, %cst_10 {dimension_numbers = #tpu.dot_dimension_numbers<[1], [0], [0], [1], [0, 0, 1, 1], [], []>} : vector<16x16xf32>, vector<16x16xf32>, vector<16x16xf32> -> vector<16x16xf32>
    %c0_11 = arith.constant 0 : index
    %c0_12 = arith.constant 0 : index
    %c0_13 = arith.constant 0 : index
    %c0_14 = arith.constant 0 : index
    %10 = vector.load %arg5[%c0_11, %c0_12, %c0_13, %c0_14] : memref<2x4x16x16xf32, #tpu.memory_space<vmem>>, vector<1x1x16x16xf32>
    %11 = vector.shape_cast %10 : vector<1x1x16x16xf32> to vector<16x16xf32>
    %12 = arith.subf %9, %11 : vector<16x16xf32>
    %13 = arith.mulf %7, %12 : vector<16x16xf32>
    %14 = arith.addf %11, %13 : vector<16x16xf32>
    %c0_15 = arith.constant 0 : index
    %c0_16 = arith.constant 0 : index
    %c0_17 = arith.constant 0 : index
    %c0_18 = arith.constant 0 : index
    %c0_19 = arith.constant 0 : index
    %15 = vector.load %arg6[%c0_15, %c0_16, %c0_17, %c0_18, %c0_19] : memref<1x2x4x16x16xf32, #tpu.memory_space<vmem>>, vector<1x1x1x16x16xf32>
    %16 = vector.shape_cast %15 : vector<1x1x1x16x16xf32> to vector<16x16xf32>
    %17 = vector.shape_cast %14 : vector<16x16xf32> to vector<1x1x1x16x16xf32>
    tpu.vector_store %arg6[%c0_15, %c0_16, %c0_17, %c0_18, %c0_19], %17 {strides = array<i32>} : memref<1x2x4x16x16xf32, #tpu.memory_space<vmem>>, vector<1x1x1x16x16xf32>,
    %18 = vector.extract_strided_slice %5 {offsets = [16, 0], sizes = [16, 16], strides = [1, 1]} : vector<80x16xf32> to vector<16x16xf32>
    %cst_20 = arith.constant dense<0.000000e+00> : vector<16x16xf32>
    %19 = tpu.matmul %4, %18, %cst_20 {dimension_numbers = #tpu.dot_dimension_numbers<[1], [0], [0], [1], [0, 0, 1, 1], [], []>} : vector<16x16xf32>, vector<16x16xf32>, vector<16x16xf32> -> vector<16x16xf32>
    %c0_21 = arith.constant 0 : index
    %c1 = arith.constant 1 : index
    %c0_22 = arith.constant 0 : index
    %c0_23 = arith.constant 0 : index
    %20 = vector.load %arg5[%c0_21, %c1, %c0_22, %c0_23] : memref<2x4x16x16xf32, #tpu.memory_space<vmem>>, vector<1x1x16x16xf32>
    %21 = vector.shape_cast %20 : vector<1x1x16x16xf32> to vector<16x16xf32>
    %22 = arith.subf %19, %21 : vector<16x16xf32>
    %23 = arith.mulf %7, %22 : vector<16x16xf32>
    %24 = arith.addf %21, %23 : vector<16x16xf32>
    %c0_24 = arith.constant 0 : index
    %c0_25 = arith.constant 0 : index
    %c1_26 = arith.constant 1 : index
    %c0_27 = arith.constant 0 : index
    %c0_28 = arith.constant 0 : index
    %25 = vector.load %arg6[%c0_24, %c0_25, %c1_26, %c0_27, %c0_28] : memref<1x2x4x16x16xf32, #tpu.memory_space<vmem>>, vector<1x1x1x16x16xf32>
    %26 = vector.shape_cast %25 : vector<1x1x1x16x16xf32> to vector<16x16xf32>
    %27 = vector.shape_cast %24 : vector<16x16xf32> to vector<1x1x1x16x16xf32>
    tpu.vector_store %arg6[%c0_24, %c0_25, %c1_26, %c0_27, %c0_28], %27 {strides = array<i32>} : memref<1x2x4x16x16xf32, #tpu.memory_space<vmem>>, vector<1x1x1x16x16xf32>,
    %28 = vector.extract_strided_slice %5 {offsets = [32, 0], sizes = [16, 16], strides = [1, 1]} : vector<80x16xf32> to vector<16x16xf32>
    %cst_29 = arith.constant dense<0.000000e+00> : vector<16x16xf32>
    %29 = tpu.matmul %4, %28, %cst_29 {dimension_numbers = #tpu.dot_dimension_numbers<[1], [0], [0], [1], [0, 0, 1, 1], [], []>} : vector<16x16xf32>, vector<16x16xf32>, vector<16x16xf32> -> vector<16x16xf32>
    %c0_30 = arith.constant 0 : index
    %c2 = arith.constant 2 : index
    %c0_31 = arith.constant 0 : index
    %c0_32 = arith.constant 0 : index
    %30 = vector.load %arg5[%c0_30, %c2, %c0_31, %c0_32] : memref<2x4x16x16xf32, #tpu.memory_space<vmem>>, vector<1x1x16x16xf32>
    %31 = vector.shape_cast %30 : vector<1x1x16x16xf32> to vector<16x16xf32>
    %32 = arith.subf %29, %31 : vector<16x16xf32>
    %33 = arith.mulf %7, %32 : vector<16x16xf32>
    %34 = arith.addf %31, %33 : vector<16x16xf32>
    %c0_33 = arith.constant 0 : index
    %c0_34 = arith.constant 0 : index
    %c2_35 = arith.constant 2 : index
    %c0_36 = arith.constant 0 : index
    %c0_37 = arith.constant 0 : index
    %35 = vector.load %arg6[%c0_33, %c0_34, %c2_35, %c0_36, %c0_37] : memref<1x2x4x16x16xf32, #tpu.memory_space<vmem>>, vector<1x1x1x16x16xf32>
    %36 = vector.shape_cast %35 : vector<1x1x1x16x16xf32> to vector<16x16xf32>
    %37 = vector.shape_cast %34 : vector<16x16xf32> to vector<1x1x1x16x16xf32>
    tpu.vector_store %arg6[%c0_33, %c0_34, %c2_35, %c0_36, %c0_37], %37 {strides = array<i32>} : memref<1x2x4x16x16xf32, #tpu.memory_space<vmem>>, vector<1x1x1x16x16xf32>,
    %38 = vector.extract_strided_slice %5 {offsets = [48, 0], sizes = [16, 16], strides = [1, 1]} : vector<80x16xf32> to vector<16x16xf32>
    %cst_38 = arith.constant dense<0.000000e+00> : vector<16x16xf32>
    %39 = tpu.matmul %4, %38, %cst_38 {dimension_numbers = #tpu.dot_dimension_numbers<[1], [0], [0], [1], [0, 0, 1, 1], [], []>} : vector<16x16xf32>, vector<16x16xf32>, vector<16x16xf32> -> vector<16x16xf32>
    %c0_39 = arith.constant 0 : index
    %c3 = arith.constant 3 : index
    %c0_40 = arith.constant 0 : index
    %c0_41 = arith.constant 0 : index
    %40 = vector.load %arg5[%c0_39, %c3, %c0_40, %c0_41] : memref<2x4x16x16xf32, #tpu.memory_space<vmem>>, vector<1x1x16x16xf32>
    %41 = vector.shape_cast %40 : vector<1x1x16x16xf32> to vector<16x16xf32>
    %42 = arith.subf %39, %41 : vector<16x16xf32>
    %43 = arith.mulf %7, %42 : vector<16x16xf32>
    %44 = arith.addf %41, %43 : vector<16x16xf32>
    %c0_42 = arith.constant 0 : index
    %c0_43 = arith.constant 0 : index
    %c3_44 = arith.constant 3 : index
    %c0_45 = arith.constant 0 : index
    %c0_46 = arith.constant 0 : index
    %45 = vector.load %arg6[%c0_42, %c0_43, %c3_44, %c0_45, %c0_46] : memref<1x2x4x16x16xf32, #tpu.memory_space<vmem>>, vector<1x1x1x16x16xf32>
    %46 = vector.shape_cast %45 : vector<1x1x1x16x16xf32> to vector<16x16xf32>
    %47 = vector.shape_cast %44 : vector<16x16xf32> to vector<1x1x1x16x16xf32>
    tpu.vector_store %arg6[%c0_42, %c0_43, %c3_44, %c0_45, %c0_46], %47 {strides = array<i32>} : memref<1x2x4x16x16xf32, #tpu.memory_space<vmem>>, vector<1x1x1x16x16xf32>,
    %c0_47 = arith.constant 0 : index
    %c1_48 = arith.constant 1 : index
    %c0_49 = arith.constant 0 : index
    %c0_50 = arith.constant 0 : index
    %48 = vector.load %arg3[%c0_47, %c1_48, %c0_49, %c0_50] : memref<1x2x16x16xf32, #tpu.memory_space<vmem>>, vector<1x1x16x16xf32>
    %49 = vector.shape_cast %48 : vector<1x1x16x16xf32> to vector<16x16xf32>
    %c0_51 = arith.constant 0 : index
    %c1_52 = arith.constant 1 : index
    %c0_53 = arith.constant 0 : index
    %c0_54 = arith.constant 0 : index
    %50 = vector.load %arg4[%c0_51, %c1_52, %c0_53, %c0_54] : memref<1x2x16x16xf32, #tpu.memory_space<vmem>>, vector<1x1x16x16xf32>
    %51 = vector.shape_cast %50 : vector<1x1x16x16xf32> to vector<16x16xf32>
    %cst_55 = arith.constant dense<0.000000e+00> : vector<80x16xf32>
    %52 = tpu.matmul %0, %49, %cst_55 {dimension_numbers = #tpu.dot_dimension_numbers<[1], [0], [0], [1], [0, 0, 1, 1], [], []>} : vector<80x16xf32>, vector<16x16xf32>, vector<80x16xf32> -> vector<80x16xf32>
    %53 = vector.extract_strided_slice %52 {offsets = [64, 0], sizes = [16, 16], strides = [1, 1]} : vector<80x16xf32> to vector<16x16xf32>
    %cst_56 = arith.constant dense<0.000000e+00> : vector<16x16xf32>
    %54 = tpu.matmul %51, %53, %cst_56 {dimension_numbers = #tpu.dot_dimension_numbers<[1], [0], [0], [1], [0, 0, 1, 1], [], []>} : vector<16x16xf32>, vector<16x16xf32>, vector<16x16xf32> -> vector<16x16xf32>
    %55 = vector.extract_strided_slice %52 {offsets = [0, 0], sizes = [16, 16], strides = [1, 1]} : vector<80x16xf32> to vector<16x16xf32>
    %cst_57 = arith.constant dense<0.000000e+00> : vector<16x16xf32>
    %56 = tpu.matmul %51, %55, %cst_57 {dimension_numbers = #tpu.dot_dimension_numbers<[1], [0], [0], [1], [0, 0, 1, 1], [], []>} : vector<16x16xf32>, vector<16x16xf32>, vector<16x16xf32> -> vector<16x16xf32>
    %c1_58 = arith.constant 1 : index
    %c0_59 = arith.constant 0 : index
    %c0_60 = arith.constant 0 : index
    %c0_61 = arith.constant 0 : index
    %57 = vector.load %arg5[%c1_58, %c0_59, %c0_60, %c0_61] : memref<2x4x16x16xf32, #tpu.memory_space<vmem>>, vector<1x1x16x16xf32>
    %58 = vector.shape_cast %57 : vector<1x1x16x16xf32> to vector<16x16xf32>
    %59 = arith.subf %56, %58 : vector<16x16xf32>
    %60 = arith.mulf %54, %59 : vector<16x16xf32>
    %61 = arith.addf %58, %60 : vector<16x16xf32>
    %c0_62 = arith.constant 0 : index
    %c1_63 = arith.constant 1 : index
    %c0_64 = arith.constant 0 : index
    %c0_65 = arith.constant 0 : index
    %c0_66 = arith.constant 0 : index
    %62 = vector.load %arg6[%c0_62, %c1_63, %c0_64, %c0_65, %c0_66] : memref<1x2x4x16x16xf32, #tpu.memory_space<vmem>>, vector<1x1x1x16x16xf32>
    %63 = vector.shape_cast %62 : vector<1x1x1x16x16xf32> to vector<16x16xf32>
    %64 = vector.shape_cast %61 : vector<16x16xf32> to vector<1x1x1x16x16xf32>
    tpu.vector_store %arg6[%c0_62, %c1_63, %c0_64, %c0_65, %c0_66], %64 {strides = array<i32>} : memref<1x2x4x16x16xf32, #tpu.memory_space<vmem>>, vector<1x1x1x16x16xf32>,
    %65 = vector.extract_strided_slice %52 {offsets = [16, 0], sizes = [16, 16], strides = [1, 1]} : vector<80x16xf32> to vector<16x16xf32>
    %cst_67 = arith.constant dense<0.000000e+00> : vector<16x16xf32>
    %66 = tpu.matmul %51, %65, %cst_67 {dimension_numbers = #tpu.dot_dimension_numbers<[1], [0], [0], [1], [0, 0, 1, 1], [], []>} : vector<16x16xf32>, vector<16x16xf32>, vector<16x16xf32> -> vector<16x16xf32>
    %c1_68 = arith.constant 1 : index
    %c1_69 = arith.constant 1 : index
    %c0_70 = arith.constant 0 : index
    %c0_71 = arith.constant 0 : index
    %67 = vector.load %arg5[%c1_68, %c1_69, %c0_70, %c0_71] : memref<2x4x16x16xf32, #tpu.memory_space<vmem>>, vector<1x1x16x16xf32>
    %68 = vector.shape_cast %67 : vector<1x1x16x16xf32> to vector<16x16xf32>
    %69 = arith.subf %66, %68 : vector<16x16xf32>
    %70 = arith.mulf %54, %69 : vector<16x16xf32>
    %71 = arith.addf %68, %70 : vector<16x16xf32>
    %c0_72 = arith.constant 0 : index
    %c1_73 = arith.constant 1 : index
    %c1_74 = arith.constant 1 : index
    %c0_75 = arith.constant 0 : index
    %c0_76 = arith.constant 0 : index
    %72 = vector.load %arg6[%c0_72, %c1_73, %c1_74, %c0_75, %c0_76] : memref<1x2x4x16x16xf32, #tpu.memory_space<vmem>>, vector<1x1x1x16x16xf32>
    %73 = vector.shape_cast %72 : vector<1x1x1x16x16xf32> to vector<16x16xf32>
    %74 = vector.shape_cast %71 : vector<16x16xf32> to vector<1x1x1x16x16xf32>
    tpu.vector_store %arg6[%c0_72, %c1_73, %c1_74, %c0_75, %c0_76], %74 {strides = array<i32>} : memref<1x2x4x16x16xf32, #tpu.memory_space<vmem>>, vector<1x1x1x16x16xf32>,
    %75 = vector.extract_strided_slice %52 {offsets = [32, 0], sizes = [16, 16], strides = [1, 1]} : vector<80x16xf32> to vector<16x16xf32>
    %cst_77 = arith.constant dense<0.000000e+00> : vector<16x16xf32>
    %76 = tpu.matmul %51, %75, %cst_77 {dimension_numbers = #tpu.dot_dimension_numbers<[1], [0], [0], [1], [0, 0, 1, 1], [], []>} : vector<16x16xf32>, vector<16x16xf32>, vector<16x16xf32> -> vector<16x16xf32>
    %c1_78 = arith.constant 1 : index
    %c2_79 = arith.constant 2 : index
    %c0_80 = arith.constant 0 : index
    %c0_81 = arith.constant 0 : index
    %77 = vector.load %arg5[%c1_78, %c2_79, %c0_80, %c0_81] : memref<2x4x16x16xf32, #tpu.memory_space<vmem>>, vector<1x1x16x16xf32>
    %78 = vector.shape_cast %77 : vector<1x1x16x16xf32> to vector<16x16xf32>
    %79 = arith.subf %76, %78 : vector<16x16xf32>
    %80 = arith.mulf %54, %79 : vector<16x16xf32>
    %81 = arith.addf %78, %80 : vector<16x16xf32>
    %c0_82 = arith.constant 0 : index
    %c1_83 = arith.constant 1 : index
    %c2_84 = arith.constant 2 : index
    %c0_85 = arith.constant 0 : index
    %c0_86 = arith.constant 0 : index
    %82 = vector.load %arg6[%c0_82, %c1_83, %c2_84, %c0_85, %c0_86] : memref<1x2x4x16x16xf32, #tpu.memory_space<vmem>>, vector<1x1x1x16x16xf32>
    %83 = vector.shape_cast %82 : vector<1x1x1x16x16xf32> to vector<16x16xf32>
    %84 = vector.shape_cast %81 : vector<16x16xf32> to vector<1x1x1x16x16xf32>
    tpu.vector_store %arg6[%c0_82, %c1_83, %c2_84, %c0_85, %c0_86], %84 {strides = array<i32>} : memref<1x2x4x16x16xf32, #tpu.memory_space<vmem>>, vector<1x1x1x16x16xf32>,
    %85 = vector.extract_strided_slice %52 {offsets = [48, 0], sizes = [16, 16], strides = [1, 1]} : vector<80x16xf32> to vector<16x16xf32>
    %cst_87 = arith.constant dense<0.000000e+00> : vector<16x16xf32>
    %86 = tpu.matmul %51, %85, %cst_87 {dimension_numbers = #tpu.dot_dimension_numbers<[1], [0], [0], [1], [0, 0, 1, 1], [], []>} : vector<16x16xf32>, vector<16x16xf32>, vector<16x16xf32> -> vector<16x16xf32>
    %c1_88 = arith.constant 1 : index
    %c3_89 = arith.constant 3 : index
    %c0_90 = arith.constant 0 : index
    %c0_91 = arith.constant 0 : index
    %87 = vector.load %arg5[%c1_88, %c3_89, %c0_90, %c0_91] : memref<2x4x16x16xf32, #tpu.memory_space<vmem>>, vector<1x1x16x16xf32>
    %88 = vector.shape_cast %87 : vector<1x1x16x16xf32> to vector<16x16xf32>
    %89 = arith.subf %86, %88 : vector<16x16xf32>
    %90 = arith.mulf %54, %89 : vector<16x16xf32>
    %91 = arith.addf %88, %90 : vector<16x16xf32>
    %c0_92 = arith.constant 0 : index
    %c1_93 = arith.constant 1 : index
    %c3_94 = arith.constant 3 : index
    %c0_95 = arith.constant 0 : index
    %c0_96 = arith.constant 0 : index
    %92 = vector.load %arg6[%c0_92, %c1_93, %c3_94, %c0_95, %c0_96] : memref<1x2x4x16x16xf32, #tpu.memory_space<vmem>>, vector<1x1x1x16x16xf32>
    %93 = vector.shape_cast %92 : vector<1x1x1x16x16xf32> to vector<16x16xf32>
    %94 = vector.shape_cast %91 : vector<16x16xf32> to vector<1x1x1x16x16xf32>
    tpu.vector_store %arg6[%c0_92, %c1_93, %c3_94, %c0_95, %c0_96], %94 {strides = array<i32>} : memref<1x2x4x16x16xf32, #tpu.memory_space<vmem>>, vector<1x1x1x16x16xf32>,
    return
  }
  func.func @transform_0(%arg0: i32, %arg1: i32) -> (i32, i32) {
    %c0_i32 = arith.constant 0 : i32
    %c0_i32_0 = arith.constant 0 : i32
    %c0_i32_1 = arith.constant 0 : i32
    return %c0_i32, %c0_i32_0 : i32, i32
  }
  func.func @transform_1(%arg0: i32, %arg1: i32) -> (i32, i32, i32, i32) {
    %c0_i32 = arith.constant 0 : i32
    %c0_i32_0 = arith.constant 0 : i32
    %c0_i32_1 = arith.constant 0 : i32
    return %arg1, %arg0, %c0_i32, %c0_i32_0 : i32, i32, i32, i32
  }
  func.func @transform_2(%arg0: i32, %arg1: i32) -> (i32, i32, i32, i32) {
    %c0_i32 = arith.constant 0 : i32
    %c0_i32_0 = arith.constant 0 : i32
    %c0_i32_1 = arith.constant 0 : i32
    return %arg1, %arg0, %c0_i32, %c0_i32_0 : i32, i32, i32, i32
  }
  func.func @transform_3(%arg0: i32, %arg1: i32) -> (i32, i32, i32, i32) {
    %c0_i32 = arith.constant 0 : i32
    %c0_i32_0 = arith.constant 0 : i32
    %c0_i32_1 = arith.constant 0 : i32
    %c0_i32_2 = arith.constant 0 : i32
    return %arg0, %c0_i32, %c0_i32_0, %c0_i32_1 : i32, i32, i32, i32
  }
  func.func @transform_4(%arg0: i32, %arg1: i32) -> (i32, i32, i32, i32, i32) {
    %c0_i32 = arith.constant 0 : i32
    %c0_i32_0 = arith.constant 0 : i32
    %c0_i32_1 = arith.constant 0 : i32
    %c0_i32_2 = arith.constant 0 : i32
    return %arg1, %arg0, %c0_i32, %c0_i32_0, %c0_i32_1 : i32, i32, i32, i32, i32
  }
}

</mosaic_0001>

<bundles_post_ra>
// kernel: tpu_custom_call.1
= control target key start
LH: loop header
LB: loop body
LE: loop exit
PB: predicated region body
PF: predicated region fallthrough
CT: control target
= control target key end

     0   :  { %s2380_s0 = inlined_call_operand.vmem [shape: f32[80,16], index: 0, kind: input, shape index: {}]   ;;  %s2381_s1 = inlined_call_operand.vmem [shape: f32[2,2,16,16], index: 1, kind: input, shape index: {}]   ;;  %s2382_s2 = inlined_call_operand.hbm [shape: f32[2,2,16,16], index: 2, kind: input, shape index: {}]   ;;  %s2383_s3 = inlined_call_operand.hbm [shape: f32[2,4,16,16], index: 3, kind: input, shape index: {}]   ;;  %s2384_s4 = inlined_call_operand.hbm [shape: f32[2,2,4,16,16], index: 4, kind: output, shape index: {}]  }
   0x1   :  { %2388 = sst [smem:[#allocation11_spill]] %s2383_s3 }
   0x2   :  { %9 = vsyncpa [#allocation3], 0 }
   0x3   :  { %11 = vsyncpa [#allocation3 + $0x1], 0 }
   0x4   :  { %12 = vsyncpa [#allocation6], 0 }
   0x5   :  { %13 = vsyncpa [#allocation4], 0 }
   0x6   :  { %15 = vsyncpa [#allocation4 + $0x1], 0  ;;  %s2076_s15 = smov 0   ;;  %s2078_s16 = smov 0  }
   0x7   :  { %s2080_s17 = smov 0   ;;  %s2082_s18 = smov 0  }
   0x8   :  { %s2084_s19 = smov 0   ;;  %s2086_s20 = smov 0  }
   0x9 LB: > { %s1575_s21 = sadd.s32 4294967295, %s2042_s20   ;;  %s1576_s22 = sadd.s32 4294967294, %s2042_s20   ;;  %s2042_s20 = sphi %s2086_s20, %s21_s20   ;;  %s2038_s19 = sphi %s2084_s19, %s2408_s19   ;;  %s2034_s18 = sphi %s2082_s18, %s2407_s18   ;;  %s2030_s17 = sphi %s2080_s17, %s2406_s17   ;;  %s2026_s16 = sphi %s2078_s16, %s2405_s16   ;;  %s2022_s15 = sphi %s2076_s15, %s2404_s15  }
   0xa   : > { %p104_p0 = scmp.ne.s32.totalorder %s2026_s16, %s2022_s15  ;;  %p2110_p1 = scmp.eq.s32.totalorder %s1575_s21, 0 }
   0xb   : > { %p2114_p2 = scmp.eq.s32.totalorder %s1575_s21, 1  ;;  %p162_p3 = scmp.eq.s32.totalorder %s1576_s22, 1 }
   0xc   : > { %p2120_p4 = por %p2110_p1, %p104_p0  ;;  %p1577_p5 = scmp.ge.s32.totalorder %s2042_s20, 1 }
   0xd   : > { %p2125_p6 = por %p162_p3, %p104_p0  ;;  %p169_p7 = scmp.lt.s32.totalorder %s2042_s20, 3 }
   0xe   : > { %s2391_s25 = scalar_select %p2120_p4, 1, 0 }
   0xf   : > { %s2392_s26 = scalar_select %p2125_p6, 1, 0 }
  0x10   : > { %p2130_p8 = pnand %p1577_p5, %p169_p7  ;;  %s2044_s28 = smov [#allocation5]  }
  0x11   : > { %s188_s29 = sshll.u32 %s2044_s28, 4  ;;  %s30_s5 = sadd.s32 1, %s2038_s19  ;;  %s189_s29 = int_to_ptr.vmem [resolvable:$true] %s188_s29 }
  0x12   : > { %p1835_p9 = pneg %p2130_p8  ;;  %s1915_s6 = scalar_lea.vmem %s189_s29, 2048 }
  0x13   : > { %p1916_p13 = scmp.ne.s32.totalorder %s189_s29, %s1915_s6  ;;  %p1923_p5 = scmp.lt.s32.totalorder %s189_s29, %s189_s29 }
  0x14   : > { %p2139_p11 = pnand %p1835_p9, %p2110_p1  ;;  %p1924_p7 = scmp.lt.s32.totalorder %s1915_s6, %s1915_s6 }
  0x16   : > { %p1906_p12 = pneg %p2139_p11  ;;  %p1925_p6 = por %p1924_p7, %p1923_p5 }
  0x18   : > { %p1918_p0 = pnand %p1916_p13, %p1906_p12 }
  0x1a   : > { %p1919_p3 = pneg %p1918_p0 }
  0x1c   : > { %p1926_p4 = pnand %p1925_p6, %p1919_p3 }
  0x1e   : > { %1929 = shalt.err (!%p1926_p4)
}
  0x1f   : > { %s2386_s7 = smov 128   ;;  %s2387_s8 = smov 8  }
  0x20   : > { %s2395_s3 = sld [smem:[#allocation11_spill]]  ;;  %p31_p4 = scmp.ge.s32.totalorder %s30_s5, 2 }
  0x21   : > { %s91_s11 = sadd.s32 1, %s2030_s17  ;;  %p98_p6 = scmp.ne.s32.totalorder %s2030_s17, %s2026_s16 }
  0x22   : > { %p99_p9 = scmp.eq.s32.totalorder %s2042_s20, 0  ;;  %s2410_s5 = smov (%p31_p4, %s30_s5), 0 }
  0x23   : > { %p2166_p13 = por %p2114_p2, %p98_p6  ;;  %s86_s14 = ssub.s32 %s2038_s19, %s2410_s5 }
  0x24   : > { %p2160_p12 = por %p99_p9, %p98_p6  ;;  %p1848_p0 = scmp.lt.s32.totalorder %s2042_s20, 2 }
  0x25   : > { %s216_s21 = sand.u32 1, %s2030_s17  }
  0x26   : > { %1838 = dma.hbm_to_vmem [thread:$0]  (!%p2139_p11), %s2395_s3, 2048, %s189_s29, [#allocation6], %s2386_s7, %s2386_s7, %s2387_s8  }
  0x27   : > { %p89_p11 = scmp.eq.s32.totalorder %s86_s14, 0  ;;  %s1580_s22 = sshll.u32 %s216_s21, 5 }
  0x28   : > { %s1652_s29 = sshll.u32 %s2038_s19, 9  ;;  %s220_s10 = scalar_lea.vmem [#allocation2], %s1580_s22 }
  0x29   : > { %s2175_s28 = scalar_select %p89_p11, %s2030_s17, %s91_s11  }
  0x2a   : > { %s229_s9 = scalar_lea.hbm %s2382_s2, %s1652_s29  ;;  %s230_s7 = sshll.u32 %s220_s10, 4  ;;  %s231_s7 = int_to_ptr.vmem [resolvable:$true] %s230_s7 }
  0x2b   : > { %p2183_p2 = pnand %p1848_p0, %p2160_p12  ;;  %s217_s8 = scalar_lea.sflag [#allocation3], %s216_s21 }
  0x2c   : > { %s1943_s14 = scalar_lea.vmem %s231_s7, 512  ;;  %s2047_s11 = smov [#allocation2]  }
  0x2d   : > { %p1932_p3 = pneg %p2183_p2  ;;  %p1944_p5 = scmp.ne.s32.totalorder %s231_s7, %s1943_s14 }
  0x2e   : > { %s1948_s3 = sshll.u32 %s2047_s11, 4  ;;  %s1949_s3 = int_to_ptr.vmem [resolvable:$false] %s1948_s3 }
  0x2f   : > { %p1946_p7 = pnand %p1944_p5, %p1932_p3  ;;  %s1950_s29 = scalar_lea.vmem %s1949_s3, 1024 }
  0x30   : > { %p1951_p6 = scmp.lt.s32.totalorder %s231_s7, %s1949_s3  ;;  %p1952_p9 = scmp.lt.s32.totalorder %s1950_s29, %s1943_s14 }
  0x31   : > { %p1947_p4 = pneg %p1946_p7 }
  0x32   : > { %p1953_p11 = por %p1952_p9, %p1951_p6 }
  0x34   : > { %p1954_p10 = pnand %p1953_p11, %p1947_p4 }
  0x36   : > { %1957 = shalt.err (!%p1954_p10)
}
  0x37   : > { %s2399_s12 = smov 8   ;;  %s2400_s22 = smov 128  }
  0x38   : > { %1842 = dma.hbm_to_vmem [thread:$0]  (!%p2183_p2), %s229_s9, 512, %s231_s7, %s217_s8, %s2400_s22, %s2400_s22, %s2399_s12  }
  0x39   : > { %242 = sbr.rel (%p2130_p8) target bundleno = 540 (0x21c), region = 36  ;;  %s2197_s21 = sand.u32 (!%p2130_p8), 1, %s2026_s16  }
  0x3a   : > { %s1584_s3 = sshll.u32 (!%p2130_p8), %s2197_s21, 5  ;;  %s245_s30 = scalar_lea.sflag (!%p2130_p8), [#allocation3], %s2197_s21 }
  0x3b   : > { %s2201_s6 = scalar_lea.vmem (!%p2130_p8), [#allocation2], %s1584_s3  ;;  %p2401_p10 = scmp.ne.s32.totalorder (!%p2130_p8), %s2391_s25, 0 }
  0x3e   : > { %2009 = dma.done.wait (%p2401_p10), %s245_s30, 512  }
  0x3f   : > { %2011 = vsyncadd (%p2401_p10), %s245_s30, 4294966784 }
  0x40   : > { %2013 = dma.done.wait (%p2110_p1), [#allocation6], 2048  }
  0x41   : > { %2015 = vsyncadd (%p2110_p1), [#allocation6], 4294965248  ;;  %p288_p8 = scmp.lt.s32.totalorder %s2034_s18, 1  ;;  %vm315_vm0 = vcmask 130048   ;;  %v301_v2 = vld [vmem:[%s2380_s0] sm:$0xff]  ;;  %v302_v3 = vld [vmem:[%s2380_s0 + $0x8] sm:$0xff] }
  0x42   : > { %1723 = vmatprep.mubr.msk.f32.mxu0 %vm315_vm0, %v301_v2  ;;  %v303_v5 = vld [vmem:[%s2380_s0 + $0x10] sm:$0xff]  ;;  %v304_v7 = vld [vmem:[%s2380_s0 + $0x18] sm:$0xff]  ;;  %v305_v8 = vld [vmem:[%s2380_s0 + $0x20] sm:$0xff]  ;;  %s1654_s12 = sshll.u32 %s2034_s18, 11  ;;  %s2048_s8 = smov [#allocation7]  }
  0x43   : > { %s289_s27 = scalar_select %p288_p8, %s2034_s18, 1  ;;  %v306_v9 = vld [vmem:[%s2380_s0 + $0x28] sm:$0xff]  ;;  %v307_v10 = vld [vmem:[%s2380_s0 + $0x30] sm:$0xff]  ;;  %v308_v11 = vld [vmem:[%s2380_s0 + $0x38] sm:$0xff] }
  0x44   : > { %v309_v12 = vld [vmem:[%s2380_s0 + $0x40] sm:$0xff]  ;;  %v310_v13 = vld [vmem:[%s2380_s0 + $0x48] sm:$0xff]  ;;  %v1617_v34 = vld [vmem:[%s2201_s6 + $0x10] sm:$0xff]  ;;  %s1439_s18 = scalar_lea.sflag [#allocation4], %s2197_s21  ;;  %s1962_s9 = sshll.u32 %s2048_s8, 4  ;;  %s1963_s9 = int_to_ptr.vmem [resolvable:$false] %s1962_s9 }
  0x45   : > { %s1653_s7 = sshll.u32 %s289_s27, 5  ;;  %v313_v14 = vld [vmem:[%s2201_s6] sm:$0xff]  ;;  %v314_v25 = vld [vmem:[%s2201_s6 + $0x8] sm:$0xff]  ;;  %v1618_v37 = vld [vmem:[%s2201_s6 + $0x18] sm:$0xff]  ;;  %s1586_s6 = sshll.u32 %s2197_s21, 7 }
  0x46   : > { %s296_s10 = scalar_lea.vmem %s2381_s1, %s1653_s7  ;;  %1742 = vmatprep.mubr.msk.f32.mxu1 %vm315_vm0, %v313_v14  ;;  %v618_v40 = vld [vmem:[#allocation5 + $0x8] sm:$0xff]  ;;  %v617_v42 = vld [vmem:[#allocation5] sm:$0xff]  ;;  %v704_v45 = vld [vmem:[#allocation5 + $0x18] sm:$0xff]  ;;  %s2291_s29 = scalar_lea.vmem [#allocation7], %s1586_s6 }
  0x47   : > { %v312_v0 = vld [vmem:[%s296_s10 + $0x8] sm:$0xff]  ;;  %v311_v1 = vld [vmem:[%s296_s10] sm:$0xff]  ;;  %v1616_v4 = vld [vmem:[%s296_s10 + $0x18] sm:$0xff]  ;;  %s1455_s22 = sshll.u32 %s2291_s29, 4  ;;  %s2326_s27 = scalar_lea.hbm %s2384_s4, %s1654_s12  ;;  %s2328_s22 = int_to_ptr.vmem [resolvable:$true] %s1455_s22 }
  0x48   : > { %1719 = vmatprep.subr.mxu0 %v312_v0  ;;  %v1615_v6 = vld [vmem:[%s296_s10 + $0x10] sm:$0xff]  ;;  %v791_v54 = vld [vmem:[#allocation5 + $0x28] sm:$0xff]  ;;  %v790_v59 = vld [vmem:[#allocation5 + $0x20] sm:$0xff]  ;;  %s1958_s7 = scalar_lea.vmem %s2328_s22, 2048  ;;  %s1964_s10 = scalar_lea.vmem %s1963_s9, 4096 }
  0x49   : > { %1720 = vmatpush3.msra.mxu0 %v312_v0  ;;  %v703_v49 = vld [vmem:[#allocation5 + $0x10] sm:$0xff]  ;;  %v878_v0 = vld [vmem:[#allocation5 + $0x38] sm:$0xff]  ;;  %p1959_p1 = scmp.ne.s32.totalorder %s2328_s22, %s1958_s7  ;;  %p1965_p2 = scmp.lt.s32.totalorder %s2328_s22, %s1963_s9 }
  0x4a   : > { %1721 = vmatprep.subr.mxu0 %v311_v1  ;;  %p1966_p3 = scmp.lt.s32.totalorder %s1964_s10, %s1958_s7 }
  0x4b   : > { %1722 = vmatpush3.msra.mxu0 %v311_v1  ;;  %p1960_p12 = pnand %p1959_p1, %p2166_p13 }
  0x4c   : > { %1724 = vmatmul.mubr.msk.f32.vlgmr.msra.gmra.mxu0 %vm315_vm0, %v302_v3  ;;  %1773 = vmatprep.subr.mxu0 %v1616_v4  ;;  %p1967_p5 = por %p1966_p3, %p1965_p2 }
  0x4d   : > { %1774 = vmatpush3.msra.mxu0 %v1616_v4  ;;  %1726 = vmatprep.mubr.msk.f32.mxu0 %vm315_vm0, %v303_v5  ;;  %p1961_p0 = pneg %p1960_p12 }
  0x4e   : > { %1775 = vmatprep.subr.mxu0 %v1615_v6 }
  0x4f   : > { %1776 = vmatpush3.msra.mxu0 %v1615_v6  ;;  %p1968_p7 = pnand %p1967_p5, %p1961_p0 }
  0x50   : > { %1727 = vmatmul.mubr.msk.f32.gmra.mxu0 %vm315_vm0, %v304_v7 }
  0x51   : > { %1729 = vmatprep.mubr.msk.f32.mxu0 %vm315_vm0, %v305_v8 }
  0x54   : > { %1730 = vmatmul.mubr.msk.f32.gmra.mxu0 %vm315_vm0, %v306_v9 }
  0x55   : > { %1732 = vmatprep.mubr.msk.f32.mxu0 %vm315_vm0, %v307_v10 }
  0x58   : > { %1733 = vmatmul.mubr.msk.f32.gmra.mxu0 %vm315_vm0, %v308_v11 }
  0x59   : > { %1735 = vmatprep.mubr.msk.f32.mxu0 %vm315_vm0, %v309_v12 }
  0x5c   : > { %1736 = vmatmul.mubr.msk.f32.gmra.mxu0 %vm315_vm0, %v310_v13 }
  0x5d   : > { %1777 = vmatprep.mubr.msk.f32.mxu0 %vm315_vm0, %v301_v2 }
  0x60   : > { %1778 = vmatmul.mubr.msk.f32.vlgmr.msra.gmra.mxu0 %vm315_vm0, %v302_v3 }
  0x61   : > { %1780 = vmatprep.mubr.msk.f32.mxu0 %vm315_vm0, %v303_v5  ;;  %v877_v5 = vld [vmem:[#allocation5 + $0x30] sm:$0xff] }
  0x64   : > { %1781 = vmatmul.mubr.msk.f32.gmra.mxu0 %vm315_vm0, %v304_v7 }
  0x65   : > { %1783 = vmatprep.mubr.msk.f32.mxu0 %vm315_vm0, %v305_v8 }
  0x68   : > { %1784 = vmatmul.mubr.msk.f32.gmra.mxu0 %vm315_vm0, %v306_v9 }
  0x69   : > { %1786 = vmatprep.mubr.msk.f32.mxu0 %vm315_vm0, %v307_v10 }
  0x6c   : > { %1787 = vmatmul.mubr.msk.f32.gmra.mxu0 %vm315_vm0, %v308_v11 }
  0x6d   : > { %1789 = vmatprep.mubr.msk.f32.mxu0 %vm315_vm0, %v309_v12 }
  0x70   : > { %1790 = vmatmul.mubr.msk.f32.gmra.mxu0 %vm315_vm0, %v310_v13 }
 0x10c   : > { %v1725_v15 = vpop.f32.mrf.mxu0 }
 0x10e   : > { %v412_v16 = vpop.f32.mrf.mxu0 }
 0x110   : > { %v1728_v17 = vpop.f32.mrf.mxu0 }
 0x112   : > { %v422_v18 = vpop.f32.mrf.mxu0 }
 0x114   : > { %v1731_v19 = vpop.f32.mrf.mxu0 }
 0x116   : > { %v432_v20 = vpop.f32.mrf.mxu0 }
 0x118   : > { %v1734_v21 = vpop.f32.mrf.mxu0 }
 0x11a   : > { %v442_v22 = vpop.f32.mrf.mxu0 }
 0x11c   : > { %v1737_v23 = vpop.f32.mrf.mxu0 }
 0x11d   : > { %1738 = vmatprep.subr.mxu1 %v1737_v23 }
 0x11e   : > { %v452_v24 = vpop.f32.mrf.mxu0  ;;  %1739 = vmatpush3.msra.mxu1 %v1737_v23  ;;  %v1254_v23 = vld [vmem:[#allocation5 + $0x58] sm:$0xff] }
 0x11f   : > { %1740 = vmatprep.subr.mxu1 %v452_v24 }
 0x120   : > { %1741 = vmatpush3.msra.mxu1 %v452_v24  ;;  %v1779_v26 = vpop.f32.mrf.mxu0 }
 0x121   : > { %1743 = vmatmul.mubr.msk.f32.vlgmr.msra.gmra.mxu1 %vm315_vm0, %v314_v25  ;;  %1745 = vmatprep.subr.mxu1 %v1725_v15 }
 0x122   : > { %1746 = vmatpush3.msra.mxu1 %v1725_v15  ;;  %v960_v27 = vpop.f32.mrf.mxu0  ;;  %1749 = vmatprep.mubr.msk.f32.mxu1 %vm315_vm0, %v313_v14 }
 0x123   : > { %1747 = vmatprep.subr.mxu1 %v412_v16 }
 0x124   : > { %1748 = vmatpush3.msra.mxu1 %v412_v16  ;;  %v1782_v28 = vpop.f32.mrf.mxu0 }
 0x125   : > { %1750 = vmatmul.mubr.msk.f32.vlgmr.msra.gmra.mxu1 %vm315_vm0, %v314_v25  ;;  %1752 = vmatprep.subr.mxu1 %v1728_v17 }
 0x126   : > { %1753 = vmatpush3.msra.mxu1 %v1728_v17  ;;  %v970_v29 = vpop.f32.mrf.mxu0  ;;  %1756 = vmatprep.mubr.msk.f32.mxu1 %vm315_vm0, %v313_v14  ;;  %v1167_v17 = vld [vmem:[#allocation5 + $0x48] sm:$0xff] }
 0x127   : > { %1754 = vmatprep.subr.mxu1 %v422_v18 }
 0x128   : > { %1755 = vmatpush3.msra.mxu1 %v422_v18  ;;  %v1785_v30 = vpop.f32.mrf.mxu0 }
 0x129   : > { %1757 = vmatmul.mubr.msk.f32.vlgmr.msra.gmra.mxu1 %vm315_vm0, %v314_v25  ;;  %1759 = vmatprep.subr.mxu1 %v1731_v19 }
 0x12a   : > { %1760 = vmatpush3.msra.mxu1 %v1731_v19  ;;  %v980_v31 = vpop.f32.mrf.mxu0  ;;  %1763 = vmatprep.mubr.msk.f32.mxu1 %vm315_vm0, %v313_v14 }
 0x12b   : > { %1761 = vmatprep.subr.mxu1 %v432_v20 }
 0x12c   : > { %1762 = vmatpush3.msra.mxu1 %v432_v20  ;;  %v1788_v32 = vpop.f32.mrf.mxu0  ;;  %v1166_v20 = vld [vmem:[#allocation5 + $0x40] sm:$0xff] }
 0x12d   : > { %1764 = vmatmul.mubr.msk.f32.vlgmr.msra.gmra.mxu1 %vm315_vm0, %v314_v25  ;;  %1766 = vmatprep.subr.mxu1 %v1734_v21 }
 0x12e   : > { %1767 = vmatpush3.msra.mxu1 %v1734_v21  ;;  %v990_v33 = vpop.f32.mrf.mxu0  ;;  %1770 = vmatprep.mubr.msk.f32.mxu1 %vm315_vm0, %v313_v14 }
 0x12f   : > { %1768 = vmatprep.subr.mxu1 %v442_v22 }
 0x130   : > { %1769 = vmatpush3.msra.mxu1 %v442_v22  ;;  %v1791_v35 = vpop.f32.mrf.mxu0 }
 0x131   : > { %1771 = vmatmul.mubr.msk.f32.vlgmr.msra.gmra.mxu1 %vm315_vm0, %v314_v25  ;;  %1792 = vmatprep.subr.mxu1 %v1791_v35 }
 0x132   : > { %v1000_v36 = vpop.f32.mrf.mxu0  ;;  %1793 = vmatpush3.msra.mxu1 %v1791_v35  ;;  %1796 = vmatprep.mubr.msk.f32.mxu1 %vm315_vm0, %v1617_v34 }
 0x133   : > { %1794 = vmatprep.subr.mxu1 %v1000_v36 }
 0x134   : > { %1795 = vmatpush3.msra.mxu1 %v1000_v36 }
 0x135   : > { %1797 = vmatmul.mubr.msk.f32.vlgmr.msra.gmra.mxu1 %vm315_vm0, %v1618_v37  ;;  %1799 = vmatprep.subr.mxu1 %v1779_v26 }
 0x136   : > { %1800 = vmatpush3.msra.mxu1 %v1779_v26  ;;  %1803 = vmatprep.mubr.msk.f32.mxu1 %vm315_vm0, %v1617_v34 }
 0x137   : > { %1801 = vmatprep.subr.mxu1 %v960_v27 }
 0x138   : > { %1802 = vmatpush3.msra.mxu1 %v960_v27  ;;  %v1253_v27 = vld [vmem:[#allocation5 + $0x50] sm:$0xff] }
 0x139   : > { %1804 = vmatmul.mubr.msk.f32.vlgmr.msra.gmra.mxu1 %vm315_vm0, %v1618_v37  ;;  %1806 = vmatprep.subr.mxu1 %v1782_v28 }
 0x13a   : > { %1807 = vmatpush3.msra.mxu1 %v1782_v28  ;;  %1810 = vmatprep.mubr.msk.f32.mxu1 %vm315_vm0, %v1617_v34 }
 0x13b   : > { %1808 = vmatprep.subr.mxu1 %v970_v29 }
 0x13c   : > { %1809 = vmatpush3.msra.mxu1 %v970_v29 }
 0x13d   : > { %1811 = vmatmul.mubr.msk.f32.vlgmr.msra.gmra.mxu1 %vm315_vm0, %v1618_v37  ;;  %1813 = vmatprep.subr.mxu1 %v1785_v30 }
 0x13e   : > { %1814 = vmatpush3.msra.mxu1 %v1785_v30  ;;  %1817 = vmatprep.mubr.msk.f32.mxu1 %vm315_vm0, %v1617_v34 }
 0x13f   : > { %1815 = vmatprep.subr.mxu1 %v980_v31 }
 0x140   : > { %1816 = vmatpush3.msra.mxu1 %v980_v31 }
 0x141   : > { %1818 = vmatmul.mubr.msk.f32.vlgmr.msra.gmra.mxu1 %vm315_vm0, %v1618_v37  ;;  %1820 = vmatprep.subr.mxu1 %v1788_v32 }
 0x142   : > { %1821 = vmatpush3.msra.mxu1 %v1788_v32  ;;  %1824 = vmatprep.mubr.msk.f32.mxu1 %vm315_vm0, %v1617_v34  ;;  %v1341_v32 = vld [vmem:[#allocation5 + $0x68] sm:$0xff] }
 0x143   : > { %1822 = vmatprep.subr.mxu1 %v990_v33 }
 0x144   : > { %1823 = vmatpush3.msra.mxu1 %v990_v33 }
 0x145   : > { %1825 = vmatmul.mubr.msk.f32.vlgmr.msra.gmra.mxu1 %vm315_vm0, %v1618_v37  ;;  %v1340_v37 = vld [vmem:[#allocation5 + $0x60] sm:$0xff] }
 0x1e1   : > { %v1744_v38 = vpop.f32.mrf.mxu1 }
 0x1e3   : > { %v533_v39 = vpop.f32.mrf.mxu1 }
 0x1e5   : > { %v1751_v41 = vpop.f32.mrf.mxu1 }
 0x1e6   : > { %v620_v43 = vsub.f32 %v1751_v41, %v618_v40 }
 0x1e7   : > { %v608_v44 = vpop.f32.mrf.mxu1 }
 0x1e8   : > { %v622_v46 = vmul.f32 %v1744_v38, %v620_v43  ;;  %v619_v47 = vsub.f32 %v608_v44, %v617_v42 }
 0x1e9   : > { %v1758_v48 = vpop.f32.mrf.mxu1 }
 0x1ea   : > { %v624_v50 = vadd.f32 %v622_v46, %v618_v40  ;;  %v621_v51 = vmul.f32 %v619_v47, %v533_v39  ;;  %v706_v52 = vsub.f32 %v1758_v48, %v704_v45  ;;  %v1427_v47 = vld [vmem:[#allocation5 + $0x70] sm:$0xff] }
 0x1eb   : > { %v693_v53 = vpop.f32.mrf.mxu1 }
 0x1ec   : > { %626 = vst.msk [vmem:[%s2291_s29 + $0x8] sm:$0xff] %vm315_vm0, %v624_v50  ;;  %v623_v55 = vadd.f32 %v621_v51, %v617_v42  ;;  %v708_v56 = vmul.f32 %v1744_v38, %v706_v52  ;;  %v705_v57 = vsub.f32 %v693_v53, %v703_v49  ;;  %v1428_v42 = vld [vmem:[#allocation5 + $0x78] sm:$0xff] }
 0x1ed   : > { %v1765_v58 = vpop.f32.mrf.mxu1 }
 0x1ee   : > { %625 = vst.msk [vmem:[%s2291_s29] sm:$0xff] %vm315_vm0, %v623_v55  ;;  %v710_v60 = vadd.f32 %v708_v56, %v704_v45  ;;  %v707_v61 = vmul.f32 %v705_v57, %v533_v39  ;;  %v793_v62 = vsub.f32 %v1765_v58, %v791_v54 }
 0x1ef   : > { %v780_v63 = vpop.f32.mrf.mxu1 }
 0x1f0   : > { %1606 = vst.msk [vmem:[%s2291_s29 + $0x18] sm:$0xff] %vm315_vm0, %v710_v60  ;;  %v709_v1 = vadd.f32 %v707_v61, %v703_v49  ;;  %v795_v2 = vmul.f32 %v1744_v38, %v793_v62  ;;  %v792_v3 = vsub.f32 %v780_v63, %v790_v59 }
 0x1f1   : > { %v1772_v4 = vpop.f32.mrf.mxu1 }
 0x1f2   : > { %1605 = vst.msk [vmem:[%s2291_s29 + $0x10] sm:$0xff] %vm315_vm0, %v709_v1  ;;  %v797_v6 = vadd.f32 %v795_v2, %v791_v54  ;;  %v794_v7 = vmul.f32 %v792_v3, %v533_v39  ;;  %v880_v8 = vsub.f32 %v1772_v4, %v878_v0 }
 0x1f3   : > { %v867_v9 = vpop.f32.mrf.mxu1 }
 0x1f4   : > { %1610 = vst.msk [vmem:[%s2291_s29 + $0x28] sm:$0xff] %vm315_vm0, %v797_v6  ;;  %v796_v10 = vadd.f32 %v794_v7, %v790_v59  ;;  %v882_v11 = vmul.f32 %v1744_v38, %v880_v8  ;;  %v879_v12 = vsub.f32 %v867_v9, %v877_v5 }
 0x1f5   : > { %v1798_v13 = vpop.f32.mrf.mxu1 }
 0x1f6   : > { %1609 = vst.msk [vmem:[%s2291_s29 + $0x20] sm:$0xff] %vm315_vm0, %v796_v10  ;;  %v884_v14 = vadd.f32 %v882_v11, %v878_v0  ;;  %v881_v15 = vmul.f32 %v879_v12, %v533_v39 }
 0x1f7   : > { %v1081_v16 = vpop.f32.mrf.mxu1 }
 0x1f8   : > { %1614 = vst.msk [vmem:[%s2291_s29 + $0x38] sm:$0xff] %vm315_vm0, %v884_v14  ;;  %v883_v18 = vadd.f32 %v881_v15, %v877_v5 }
 0x1f9   : > { %v1805_v19 = vpop.f32.mrf.mxu1 }
 0x1fa   : > { %1613 = vst.msk [vmem:[%s2291_s29 + $0x30] sm:$0xff] %vm315_vm0, %v883_v18  ;;  %v1169_v21 = vsub.f32 %v1805_v19, %v1167_v17 }
 0x1fb   : > { %v1156_v22 = vpop.f32.mrf.mxu1 }
 0x1fc   : > { %v1171_v24 = vmul.f32 %v1798_v13, %v1169_v21  ;;  %v1168_v25 = vsub.f32 %v1156_v22, %v1166_v20 }
 0x1fd   : > { %v1812_v26 = vpop.f32.mrf.mxu1 }
 0x1fe   : > { %v1173_v28 = vadd.f32 %v1171_v24, %v1167_v17  ;;  %v1170_v29 = vmul.f32 %v1168_v25, %v1081_v16  ;;  %v1256_v30 = vsub.f32 %v1812_v26, %v1254_v23 }
 0x1ff   : > { %v1243_v31 = vpop.f32.mrf.mxu1 }
 0x200   : > { %1634 = vst.msk [vmem:[%s2291_s29 + $0x48] sm:$0xff] %vm315_vm0, %v1173_v28  ;;  %v1172_v33 = vadd.f32 %v1170_v29, %v1166_v20  ;;  %v1258_v34 = vmul.f32 %v1798_v13, %v1256_v30  ;;  %v1255_v35 = vsub.f32 %v1243_v31, %v1253_v27 }
 0x201   : > { %v1819_v36 = vpop.f32.mrf.mxu1 }
 0x202   : > { %1633 = vst.msk [vmem:[%s2291_s29 + $0x40] sm:$0xff] %vm315_vm0, %v1172_v33  ;;  %v1260_v38 = vadd.f32 %v1258_v34, %v1254_v23  ;;  %v1257_v39 = vmul.f32 %v1255_v35, %v1081_v16  ;;  %v1343_v40 = vsub.f32 %v1819_v36, %v1341_v32 }
 0x203   : > { %v1330_v41 = vpop.f32.mrf.mxu1 }
 0x204   : > { %1638 = vst.msk [vmem:[%s2291_s29 + $0x58] sm:$0xff] %vm315_vm0, %v1260_v38  ;;  %v1259_v43 = vadd.f32 %v1257_v39, %v1253_v27  ;;  %v1345_v44 = vmul.f32 %v1798_v13, %v1343_v40  ;;  %v1342_v45 = vsub.f32 %v1330_v41, %v1340_v37 }
 0x205   : > { %v1826_v46 = vpop.f32.mrf.mxu1 }
 0x206   : > { %1637 = vst.msk [vmem:[%s2291_s29 + $0x50] sm:$0xff] %vm315_vm0, %v1259_v43  ;;  %v1347_v48 = vadd.f32 %v1345_v44, %v1341_v32  ;;  %v1344_v49 = vmul.f32 %v1342_v45, %v1081_v16  ;;  %v1430_v50 = vsub.f32 %v1826_v46, %v1428_v42 }
 0x207   : > { %v1417_v51 = vpop.f32.mrf.mxu1 }
 0x208   : > { %1642 = vst.msk [vmem:[%s2291_s29 + $0x68] sm:$0xff] %vm315_vm0, %v1347_v48  ;;  %v1346_v52 = vadd.f32 %v1344_v49, %v1340_v37  ;;  %v1432_v53 = vmul.f32 %v1798_v13, %v1430_v50  ;;  %v1429_v54 = vsub.f32 %v1417_v51, %v1427_v47 }
 0x20a   : > { %1641 = vst.msk [vmem:[%s2291_s29 + $0x60] sm:$0xff] %vm315_vm0, %v1346_v52  ;;  %v1434_v55 = vadd.f32 %v1432_v53, %v1428_v42  ;;  %v1431_v56 = vmul.f32 %v1429_v54, %v1081_v16 }
 0x20c   : > { %1646 = vst.msk [vmem:[%s2291_s29 + $0x78] sm:$0xff] %vm315_vm0, %v1434_v55  ;;  %v1433_v57 = vadd.f32 %v1431_v56, %v1427_v47 }
 0x20e   : > { %1645 = vst.msk [vmem:[%s2291_s29 + $0x70] sm:$0xff] %vm315_vm0, %v1433_v57 }
 0x20f   : > { %1971 = shalt.err (!%p1968_p7)
}
 0x210   : > { %s1972_s25 = scalar_lea.hbm %s2326_s27, 2048  ;;  %s1976_s14 = scalar_lea.hbm %s2384_s4, 4096 }
 0x211   : > { %p1973_p4 = scmp.ne.s32.totalorder %s2326_s27, %s1972_s25  ;;  %p1977_p11 = scmp.lt.s32.totalorder %s2326_s27, %s2384_s4 }
 0x212   : > { %p1978_p10 = scmp.lt.s32.totalorder %s1976_s14, %s1972_s25 }
 0x213   : > { %p1974_p6 = pnand %p1973_p4, %p2166_p13 }
 0x214   : > { %p1979_p8 = por %p1978_p10, %p1977_p11 }
 0x215   : > { %p1975_p9 = pneg %p1974_p6 }
 0x217   : > { %p1980_p1 = pnand %p1979_p8, %p1975_p9 }
 0x219   : > { %1983 = shalt.err (!%p1980_p1)
}
 0x21a   : > { %s2049_s29 = smov 128   ;;  %s2050_s12 = smov 8  }
 0x21b   : > { %1833 = dma.vmem_to_hbm [thread:$0]  (%p2166_p13), %s2328_s22, 2048, %s2326_s27, %s1439_s18, %s2049_s29, %s2049_s29, %s2050_s12  }
 0x21c PF: > { %s1470_s3 = sand.u32 1, %s2022_s15   ;;  %p2402_p12 = scmp.ne.s32.totalorder %s2392_s26, 0 }
 0x21d   : > { %p2403_p0 = scmp.ge.s32.totalorder %s2042_s20, 2  ;;  %s1471_s30 = scalar_lea.sflag [#allocation4], %s1470_s3 }
 0x21f   : > { %p1844_p2 = pnand %p2403_p0, %p2402_p12 }
 0x221   : > { %p1845_p3 = pneg %p1844_p2 }
 0x223   : > { %2017 = dma.done.wait (%p1845_p3), %s1471_s30, 2048  }
 0x224   : > { %2019 = vsyncadd (%p1845_p3), %s1471_s30, 4294965248  ;;  %s21_s20 = sadd.s32 1, %s2042_s20   ;;  %s2404_s15 = smov %s2026_s16 }
 0x225   : > { %p18_p5 = scmp.ge.s32.totalorder %s21_s20, 4   ;;  %s2405_s16 = smov %s2030_s17 }
 0x226   : > { %s2406_s17 = smov %s2175_s28  ;;  %s2407_s18 = smov %s2038_s19 }
 0x227   : > { %s2408_s19 = smov %s2410_s5  ;;  %20 = sbr.rel (!%p18_p5) target bundleno = 9 (0x9), region = 105 }
 0x22c   :  { %1476 = vsyncpa [#allocation3], 1 }
 0x22d   :  { %1478 = vsyncpa [#allocation3 + $0x1], 1 }
 0x22e   :  { %1479 = vsyncpa [#allocation6], 1 }
 0x22f   :  { %1480 = vsyncpa [#allocation4], 1 }
 0x230   :  { %1482 = vsyncpa [#allocation4 + $0x1], 1 }

</bundles_post_ra>
